<compile_context>
chip_gen: v7x
topology: tpu7x:2x2x1
jax: 0.10.0
libtpu: 0.0.40
codegen_flags: <defaults>
</compile_context>

<pallas_src>
import jax
import jax.numpy as jnp
from jax.experimental import pallas as pl
from jax.experimental.pallas import tpu as pltpu


def _round_up(a, m):
    return ((a + m - 1) // m) * m


def mlp_diffusion_kernel(
    x_ref, t_ref,
    w1_ref, e1_ref, w2_ref, e2_ref, w3_ref, e3_ref, w4_ref, b4_ref,
    o_ref,
):
    n_steps = e1_ref.shape[0]
    tile_b = x_ref.shape[0]

    # In-kernel embedding "gather": one-hot(t) @ emb  (exact: one 1.0 term per row).
    t = t_ref[...]  # (TILE_B, 1) int32
    steps = jax.lax.broadcasted_iota(jnp.int32, (tile_b, n_steps), 1)
    onehot = (t == steps).astype(jnp.float32)  # (TILE_B, n_steps)

    x = x_ref[...]          # (TILE_B, 2)
    w1 = w1_ref[...]        # (2, U)

    # Block 1: Linear(2 -> U) as two VPU broadcast-FMAs (skip tiny-K MXU pass),
    # then += (emb1(t) + b1), ReLU.
    h = x[:, 0:1] * w1[0:1, :] + x[:, 1:2] * w1[1:2, :]
    h = h + jnp.dot(onehot, e1_ref[...], preferred_element_type=jnp.float32)
    h = jnp.maximum(h, 0.0)

    # Block 2: Linear(U -> U), += (emb2(t) + b2), ReLU
    h = jnp.dot(h, w2_ref[...], preferred_element_type=jnp.float32)
    h = h + jnp.dot(onehot, e2_ref[...], preferred_element_type=jnp.float32)
    h = jnp.maximum(h, 0.0)

    # Block 3: Linear(U -> U), += (emb3(t) + b3), ReLU
    h = jnp.dot(h, w3_ref[...], preferred_element_type=jnp.float32)
    h = h + jnp.dot(onehot, e3_ref[...], preferred_element_type=jnp.float32)
    h = jnp.maximum(h, 0.0)

    # Output: Linear(U -> 2)
    out = jnp.dot(h, w4_ref[...], preferred_element_type=jnp.float32) + b4_ref[...]
    o_ref[...] = out.astype(o_ref.dtype)


def mlp_diffusion_forward(x, t, params, tile_b=256):
    """x: (B, 2) f32, t: (B,) int32. Returns (B, 2) f32."""
    (w1, b1, w2, b2, w3, b3, w4, b4, emb1, emb2, emb3) = params

    B = x.shape[0]
    U = w1.shape[1]
    n_steps = emb1.shape[0]

    # Fold per-layer biases into the (tiny) embedding tables: h + b + emb == h + (emb + b).
    e1b = emb1 + b1[None, :]
    e2b = emb2 + b2[None, :]
    e3b = emb3 + b3[None, :]

    # Batch tiling: multiple of 8 (sublane), capped at 256 (MXU-height friendly,
    # modest vreg pressure). Pad the batch to a whole number of tiles.
    tile_b = min(tile_b, _round_up(B, 8))
    b_pad = _round_up(B, tile_b)
    if b_pad != B:
        x = jnp.pad(x, ((0, b_pad - B), (0, 0)))
        t = jnp.pad(t, ((0, b_pad - B),))
    t2d = t.astype(jnp.int32).reshape(b_pad, 1)

    grid = (b_pad // tile_b,)

    def batch_spec(feat):
        return pl.BlockSpec((tile_b, feat), lambda i: (i, 0))

    def const_spec(rows, cols):
        return pl.BlockSpec((rows, cols), lambda i: (0, 0))

    out = pl.pallas_call(
        mlp_diffusion_kernel,
        out_shape=jax.ShapeDtypeStruct((b_pad, 2), jnp.float32),
        grid=grid,
        in_specs=[
            batch_spec(2),            # x          (streamed per batch tile)
            batch_spec(1),            # t          (streamed per batch tile)
            const_spec(2, U),         # w1         (VMEM-resident)
            const_spec(n_steps, U),   # emb1 + b1  (VMEM-resident)
            const_spec(U, U),         # w2
            const_spec(n_steps, U),   # emb2 + b2
            const_spec(U, U),         # w3
            const_spec(n_steps, U),   # emb3 + b3
            const_spec(U, 2),         # w4
            const_spec(1, 2),         # b4
        ],
        out_specs=batch_spec(2),
        compiler_params=pltpu.CompilerParams(
            dimension_semantics=("parallel",),
        ),
    )(x, t2d, w1, e1b, w2, e2b, w3, e3b, w4, b4[None, :])

    return out[:B]


def init_params(key, n_steps, num_units=128):
    """Deterministic synthetic parameters matching MLPDiffusion.__init__ shapes.

    Linear weights are stored transposed, i.e. (in_features, out_features).
    """
    keys = jax.random.split(key, 11)

    def linear(kw, kb, fan_in, fan_out):
        bound = 1.0 / jnp.sqrt(fan_in)
        w = jax.random.uniform(kw, (fan_in, fan_out), jnp.float32, -bound, bound)
        b = jax.random.uniform(kb, (fan_out,), jnp.float32, -bound, bound)
        return w, b

    w1, b1 = linear(keys[0], keys[1], 2, num_units)
    w2, b2 = linear(keys[2], keys[3], num_units, num_units)
    w3, b3 = linear(keys[4], keys[5], num_units, num_units)
    w4, b4 = linear(keys[6], keys[7], num_units, 2)

    emb1 = jax.random.normal(keys[8], (n_steps, num_units), jnp.float32)
    emb2 = jax.random.normal(keys[9], (n_steps, num_units), jnp.float32)
    emb3 = jax.random.normal(keys[10], (n_steps, num_units), jnp.float32)

    return (w1, b1, w2, b2, w3, b3, w4, b4, emb1, emb2, emb3)


def reference_forward(x, t, params):
    """Plain-JAX reference mirroring the PyTorch forward exactly."""
    (w1, b1, w2, b2, w3, b3, w4, b4, emb1, emb2, emb3) = params
    h = jnp.maximum(x @ w1 + b1 + emb1[t], 0.0)
    h = jnp.maximum(h @ w2 + b2 + emb2[t], 0.0)
    h = jnp.maximum(h @ w3 + b3 + emb3[t], 0.0)
    return h @ w4 + b4


if __name__ == "__main__":
    key = jax.random.PRNGKey(0)
    k_param, k_x, k_t, k_x2, k_t2 = jax.random.split(key, 5)

    n_steps = 16
    num_units = 128

    params = init_params(k_param, n_steps, num_units)

    # Small batch (single grid step, padded to a sublane multiple).
    batch = 8
    x = jax.random.normal(k_x, (batch, 2), jnp.float32)
    t = jax.random.randint(k_t, (batch,), 0, n_steps, jnp.int32)

    out = mlp_diffusion_forward(x, t, params)
    out = jax.block_until_ready(out)
    ref = reference_forward(x, t, params)
    assert out.shape == (batch, 2)
    assert jnp.allclose(out, ref, atol=1e-4, rtol=1e-4)

    # Larger batch exercising the multi-step grid + padding path.
    batch2 = 300
    x2 = jax.random.normal(k_x2, (batch2, 2), jnp.float32)
    t2 = jax.random.randint(k_t2, (batch2,), 0, n_steps, jnp.int32)

    out2 = mlp_diffusion_forward(x2, t2, params)
    out2 = jax.block_until_ready(out2)
    ref2 = reference_forward(x2, t2, params)
    assert out2.shape == (batch2, 2)
    assert jnp.allclose(out2, ref2, atol=1e-4, rtol=1e-4)

    print("KERNEL_OK")
</pallas_src>

<mosaic_0001>
module attributes {stable_mosaic.version = 11 : i64} {
  func.func @mlp_diffusion_kernel(%arg0: i32, %arg1: memref<8x2xf32, #tpu.memory_space<vmem>>, %arg2: memref<8x1xi32, #tpu.memory_space<vmem>>, %arg3: memref<2x128xf32, #tpu.memory_space<vmem>>, %arg4: memref<16x128xf32, #tpu.memory_space<vmem>>, %arg5: memref<128x128xf32, #tpu.memory_space<vmem>>, %arg6: memref<16x128xf32, #tpu.memory_space<vmem>>, %arg7: memref<128x128xf32, #tpu.memory_space<vmem>>, %arg8: memref<16x128xf32, #tpu.memory_space<vmem>>, %arg9: memref<128x2xf32, #tpu.memory_space<vmem>>, %arg10: memref<1x2xf32, #tpu.memory_space<vmem>>, %arg11: memref<8x2xf32, #tpu.memory_space<vmem>>) attributes {dimension_semantics = [#tpu.dimension_semantics<parallel>], iteration_bounds = array<i64: 1>, scalar_prefetch = 0 : i64, scratch_operands = 0 : i64, tpu.core_type = #tpu.core_type<tc>, window_params = [{transform_indices = @transform_0, window_bounds = array<i64: 8, 2>}, {transform_indices = @transform_1, window_bounds = array<i64: 8, 1>}, {pipeline_mode = #tpu.pipeline_mode<synchronous>, transform_indices = @transform_2, window_bounds = array<i64: 2, 128>}, {pipeline_mode = #tpu.pipeline_mode<synchronous>, transform_indices = @transform_3, window_bounds = array<i64: 16, 128>}, {pipeline_mode = #tpu.pipeline_mode<synchronous>, transform_indices = @transform_4, window_bounds = array<i64: 128, 128>}, {pipeline_mode = #tpu.pipeline_mode<synchronous>, transform_indices = @transform_5, window_bounds = array<i64: 16, 128>}, {pipeline_mode = #tpu.pipeline_mode<synchronous>, transform_indices = @transform_6, window_bounds = array<i64: 128, 128>}, {pipeline_mode = #tpu.pipeline_mode<synchronous>, transform_indices = @transform_7, window_bounds = array<i64: 16, 128>}, {pipeline_mode = #tpu.pipeline_mode<synchronous>, transform_indices = @transform_8, window_bounds = array<i64: 128, 2>}, {pipeline_mode = #tpu.pipeline_mode<synchronous>, transform_indices = @transform_9, window_bounds = array<i64: 1, 2>}, {transform_indices = @transform_10, window_bounds = array<i64: 8, 2>}]} {
    %c0 = arith.constant 0 : index
    %c0_0 = arith.constant 0 : index
    %0 = vector.load %arg2[%c0, %c0_0] : memref<8x1xi32, #tpu.memory_space<vmem>>, vector<8x1xi32>
    %1 = tpu.iota {dimensions = array<i32: 1>} : vector<8x16xi32>
    %2 = vector.broadcast %0 : vector<8x1xi32> to vector<8x16xi32>
    %3 = arith.cmpi eq, %2, %1 : vector<8x16xi32>
    %4 = arith.extui %3 : vector<8x16xi1> to vector<8x16xi32>
    %5 = arith.sitofp %4 : vector<8x16xi32> to vector<8x16xf32>
    %c0_1 = arith.constant 0 : index
    %c0_2 = arith.constant 0 : index
    %6 = vector.load %arg1[%c0_1, %c0_2] : memref<8x2xf32, #tpu.memory_space<vmem>>, vector<8x2xf32>
    %c0_3 = arith.constant 0 : index
    %c0_4 = arith.constant 0 : index
    %7 = vector.load %arg3[%c0_3, %c0_4] : memref<2x128xf32, #tpu.memory_space<vmem>>, vector<2x128xf32>
    %8 = vector.extract_strided_slice %6 {offsets = [0, 0], sizes = [8, 1], strides = [1, 1]} : vector<8x2xf32> to vector<8x1xf32>
    %9 = vector.extract_strided_slice %7 {offsets = [0, 0], sizes = [1, 128], strides = [1, 1]} : vector<2x128xf32> to vector<1x128xf32>
    %10 = vector.broadcast %8 : vector<8x1xf32> to vector<8x128xf32>
    %11 = vector.broadcast %9 : vector<1x128xf32> to vector<8x128xf32>
    %12 = arith.mulf %10, %11 : vector<8x128xf32>
    %13 = vector.extract_strided_slice %6 {offsets = [0, 1], sizes = [8, 1], strides = [1, 1]} : vector<8x2xf32> to vector<8x1xf32>
    %14 = vector.extract_strided_slice %7 {offsets = [1, 0], sizes = [1, 128], strides = [1, 1]} : vector<2x128xf32> to vector<1x128xf32>
    %15 = vector.broadcast %13 : vector<8x1xf32> to vector<8x128xf32>
    %16 = vector.broadcast %14 : vector<1x128xf32> to vector<8x128xf32>
    %17 = arith.mulf %15, %16 : vector<8x128xf32>
    %18 = arith.addf %12, %17 : vector<8x128xf32>
    %c0_5 = arith.constant 0 : index
    %c0_6 = arith.constant 0 : index
    %19 = vector.load %arg4[%c0_5, %c0_6] : memref<16x128xf32, #tpu.memory_space<vmem>>, vector<16x128xf32>
    %cst = arith.constant dense<0.000000e+00> : vector<8x128xf32>
    %20 = tpu.matmul %5, %19, %cst {dimension_numbers = #tpu.dot_dimension_numbers<[1], [0], [0], [1], [0, 0, 1, 1], [], []>} : vector<8x16xf32>, vector<16x128xf32>, vector<8x128xf32> -> vector<8x128xf32>
    %21 = arith.addf %18, %20 : vector<8x128xf32>
    %cst_7 = arith.constant 0.000000e+00 : f32
    %22 = vector.broadcast %cst_7 : f32 to vector<8x128xf32>
    %23 = arith.maximumf %21, %22 : vector<8x128xf32>
    %c0_8 = arith.constant 0 : index
    %c0_9 = arith.constant 0 : index
    %24 = vector.load %arg5[%c0_8, %c0_9] : memref<128x128xf32, #tpu.memory_space<vmem>>, vector<128x128xf32>
    %cst_10 = arith.constant dense<0.000000e+00> : vector<8x128xf32>
    %25 = tpu.matmul %23, %24, %cst_10 {dimension_numbers = #tpu.dot_dimension_numbers<[1], [0], [0], [1], [0, 0, 1, 1], [], []>} : vector<8x128xf32>, vector<128x128xf32>, vector<8x128xf32> -> vector<8x128xf32>
    %c0_11 = arith.constant 0 : index
    %c0_12 = arith.constant 0 : index
    %26 = vector.load %arg6[%c0_11, %c0_12] : memref<16x128xf32, #tpu.memory_space<vmem>>, vector<16x128xf32>
    %cst_13 = arith.constant dense<0.000000e+00> : vector<8x128xf32>
    %27 = tpu.matmul %5, %26, %cst_13 {dimension_numbers = #tpu.dot_dimension_numbers<[1], [0], [0], [1], [0, 0, 1, 1], [], []>} : vector<8x16xf32>, vector<16x128xf32>, vector<8x128xf32> -> vector<8x128xf32>
    %28 = arith.addf %25, %27 : vector<8x128xf32>
    %cst_14 = arith.constant 0.000000e+00 : f32
    %29 = vector.broadcast %cst_14 : f32 to vector<8x128xf32>
    %30 = arith.maximumf %28, %29 : vector<8x128xf32>
    %c0_15 = arith.constant 0 : index
    %c0_16 = arith.constant 0 : index
    %31 = vector.load %arg7[%c0_15, %c0_16] : memref<128x128xf32, #tpu.memory_space<vmem>>, vector<128x128xf32>
    %cst_17 = arith.constant dense<0.000000e+00> : vector<8x128xf32>
    %32 = tpu.matmul %30, %31, %cst_17 {dimension_numbers = #tpu.dot_dimension_numbers<[1], [0], [0], [1], [0, 0, 1, 1], [], []>} : vector<8x128xf32>, vector<128x128xf32>, vector<8x128xf32> -> vector<8x128xf32>
    %c0_18 = arith.constant 0 : index
    %c0_19 = arith.constant 0 : index
    %33 = vector.load %arg8[%c0_18, %c0_19] : memref<16x128xf32, #tpu.memory_space<vmem>>, vector<16x128xf32>
    %cst_20 = arith.constant dense<0.000000e+00> : vector<8x128xf32>
    %34 = tpu.matmul %5, %33, %cst_20 {dimension_numbers = #tpu.dot_dimension_numbers<[1], [0], [0], [1], [0, 0, 1, 1], [], []>} : vector<8x16xf32>, vector<16x128xf32>, vector<8x128xf32> -> vector<8x128xf32>
    %35 = arith.addf %32, %34 : vector<8x128xf32>
    %cst_21 = arith.constant 0.000000e+00 : f32
    %36 = vector.broadcast %cst_21 : f32 to vector<8x128xf32>
    %37 = arith.maximumf %35, %36 : vector<8x128xf32>
    %c0_22 = arith.constant 0 : index
    %c0_23 = arith.constant 0 : index
    %38 = vector.load %arg9[%c0_22, %c0_23] : memref<128x2xf32, #tpu.memory_space<vmem>>, vector<128x2xf32>
    %cst_24 = arith.constant dense<0.000000e+00> : vector<8x2xf32>
    %39 = tpu.matmul %37, %38, %cst_24 {dimension_numbers = #tpu.dot_dimension_numbers<[1], [0], [0], [1], [0, 0, 1, 1], [], []>} : vector<8x128xf32>, vector<128x2xf32>, vector<8x2xf32> -> vector<8x2xf32>
    %c0_25 = arith.constant 0 : index
    %c0_26 = arith.constant 0 : index
    %40 = vector.load %arg10[%c0_25, %c0_26] : memref<1x2xf32, #tpu.memory_space<vmem>>, vector<1x2xf32>
    %41 = vector.broadcast %40 : vector<1x2xf32> to vector<8x2xf32>
    %42 = arith.addf %39, %41 : vector<8x2xf32>
    %c0_27 = arith.constant 0 : index
    %c0_28 = arith.constant 0 : index
    %43 = vector.load %arg11[%c0_27, %c0_28] : memref<8x2xf32, #tpu.memory_space<vmem>>, vector<8x2xf32>
    tpu.vector_store %arg11[%c0_27, %c0_28], %42 {strides = array<i32>} : memref<8x2xf32, #tpu.memory_space<vmem>>, vector<8x2xf32>,
    return
  }
  func.func @transform_0(%arg0: i32) -> (i32, i32) {
    %c0_i32 = arith.constant 0 : i32
    %c0_i32_0 = arith.constant 0 : i32
    return %arg0, %c0_i32 : i32, i32
  }
  func.func @transform_1(%arg0: i32) -> (i32, i32) {
    %c0_i32 = arith.constant 0 : i32
    %c0_i32_0 = arith.constant 0 : i32
    return %arg0, %c0_i32 : i32, i32
  }
  func.func @transform_2(%arg0: i32) -> (i32, i32) {
    %c0_i32 = arith.constant 0 : i32
    %c0_i32_0 = arith.constant 0 : i32
    %c0_i32_1 = arith.constant 0 : i32
    return %c0_i32, %c0_i32_0 : i32, i32
  }
  func.func @transform_3(%arg0: i32) -> (i32, i32) {
    %c0_i32 = arith.constant 0 : i32
    %c0_i32_0 = arith.constant 0 : i32
    %c0_i32_1 = arith.constant 0 : i32
    return %c0_i32, %c0_i32_0 : i32, i32
  }
  func.func @transform_4(%arg0: i32) -> (i32, i32) {
    %c0_i32 = arith.constant 0 : i32
    %c0_i32_0 = arith.constant 0 : i32
    %c0_i32_1 = arith.constant 0 : i32
    return %c0_i32, %c0_i32_0 : i32, i32
  }
  func.func @transform_5(%arg0: i32) -> (i32, i32) {
    %c0_i32 = arith.constant 0 : i32
    %c0_i32_0 = arith.constant 0 : i32
    %c0_i32_1 = arith.constant 0 : i32
    return %c0_i32, %c0_i32_0 : i32, i32
  }
  func.func @transform_6(%arg0: i32) -> (i32, i32) {
    %c0_i32 = arith.constant 0 : i32
    %c0_i32_0 = arith.constant 0 : i32
    %c0_i32_1 = arith.constant 0 : i32
    return %c0_i32, %c0_i32_0 : i32, i32
  }
  func.func @transform_7(%arg0: i32) -> (i32, i32) {
    %c0_i32 = arith.constant 0 : i32
    %c0_i32_0 = arith.constant 0 : i32
    %c0_i32_1 = arith.constant 0 : i32
    return %c0_i32, %c0_i32_0 : i32, i32
  }
  func.func @transform_8(%arg0: i32) -> (i32, i32) {
    %c0_i32 = arith.constant 0 : i32
    %c0_i32_0 = arith.constant 0 : i32
    %c0_i32_1 = arith.constant 0 : i32
    return %c0_i32, %c0_i32_0 : i32, i32
  }
  func.func @transform_9(%arg0: i32) -> (i32, i32) {
    %c0_i32 = arith.constant 0 : i32
    %c0_i32_0 = arith.constant 0 : i32
    %c0_i32_1 = arith.constant 0 : i32
    return %c0_i32, %c0_i32_0 : i32, i32
  }
  func.func @transform_10(%arg0: i32) -> (i32, i32) {
    %c0_i32 = arith.constant 0 : i32
    %c0_i32_0 = arith.constant 0 : i32
    return %arg0, %c0_i32 : i32, i32
  }
}

</mosaic_0001>

<bundles_post_ra>
// kernel: tpu_custom_call.1
= control target key start
LH: loop header
LB: loop body
LE: loop exit
PB: predicated region body
PF: predicated region fallthrough
CT: control target
= control target key end

     0   :  { %15 = vsyncpa [#allocation3], 0  ;;  %s1177_s0 = inlined_call_operand.vmem [shape: f32[8,2], index: 0, kind: input, shape index: {}]   ;;  %s1178_s1 = inlined_call_operand.vmem [shape: s32[8,1], index: 1, kind: input, shape index: {}]   ;;  %s1179_s2 = inlined_call_operand.vmem [shape: f32[2,128], index: 2, kind: input, shape index: {}]   ;;  %s1180_s3 = inlined_call_operand.vmem [shape: f32[16,128], index: 3, kind: input, shape index: {}]   ;;  %s1181_s4 = inlined_call_operand.vmem [shape: f32[128,128], index: 4, kind: input, shape index: {}]   ;;  %s1182_s5 = inlined_call_operand.vmem [shape: f32[16,128], index: 5, kind: input, shape index: {}]   ;;  %s1183_s6 = inlined_call_operand.hbm [shape: f32[128,128], index: 6, kind: input, shape index: {}]   ;;  %s1184_s7 = inlined_call_operand.hbm [shape: f32[16,128], index: 7, kind: input, shape index: {}]   ;;  %s1185_s8 = inlined_call_operand.vmem [shape: f32[128,2], index: 8, kind: input, shape index: {}]   ;;  %s1186_s9 = inlined_call_operand.vmem [shape: f32[1,2], index: 9, kind: input, shape index: {}]   ;;  %s1187_s10 = inlined_call_operand.vmem [shape: f32[8,2], index: 10, kind: output, shape index: {}]  }
   0x1   :  { %16 = vsyncpa [#allocation5], 0  ;;  %s926_s13 = smov [#allocation2]   ;;  %s878_s17 = scalar_lea.hbm %s1183_s6, 2048 }
   0x2   :  { %s34_s14 = sshll.u32 %s926_s13, 4  ;;  %p879_p0 = scmp.ne.s32.totalorder %s1183_s6, %s878_s17  ;;  %s35_s14 = int_to_ptr.vmem [resolvable:$true] %s34_s14 }
   0x3   :  { %p882_p1 = scmp.lt.u32.totalorder %s878_s17, %s1183_s6 }
   0x5   :  { %p884_p2 = pnand %p882_p1, %p879_p0 }
   0x7   :  { %887 = shalt.err (!%p884_p2)
}
   0x8   :  { %s888_s22 = scalar_lea.vmem %s35_s14, 2048  ;;  %p893_p4 = scmp.lt.s32.totalorder %s35_s14, %s35_s14 }
   0x9   :  { %p889_p3 = scmp.ne.s32.totalorder %s35_s14, %s888_s22  ;;  %p894_p5 = scmp.lt.s32.totalorder %s888_s22, %s888_s22 }
   0xb   :  { %p895_p6 = por %p894_p5, %p893_p4 }
   0xd   :  { %p896_p7 = pnand %p895_p6, %p889_p3 }
   0xf   :  { %899 = shalt.err (!%p896_p7)
}
  0x10   :  { %s927_s23 = smov 128   ;;  %s928_s24 = smov 8  }
  0x11   :  { %40 = dma.hbm_to_vmem [thread:$0]  %s1183_s6, 2048, %s35_s14, [#allocation3], %s927_s23, %s927_s23, %s928_s24  }
  0x12   :  { %s929_s27 = smov [#allocation4]   ;;  %s900_s11 = scalar_lea.hbm %s1184_s7, 256 }
  0x13   :  { %s46_s28 = sshll.u32 %s929_s27, 4  ;;  %p901_p8 = scmp.ne.s32.totalorder %s1184_s7, %s900_s11  ;;  %s47_s28 = int_to_ptr.vmem [resolvable:$true] %s46_s28 }
  0x14   :  { %p904_p9 = scmp.lt.u32.totalorder %s900_s11, %s1184_s7 }
  0x16   :  { %p906_p10 = pnand %p904_p9, %p901_p8 }
  0x18   :  { %909 = shalt.err (!%p906_p10)
}
  0x19   :  { %s910_s17 = scalar_lea.vmem %s47_s28, 256  ;;  %p915_p12 = scmp.lt.s32.totalorder %s47_s28, %s47_s28 }
  0x1a   :  { %p911_p11 = scmp.ne.s32.totalorder %s47_s28, %s910_s17  ;;  %p916_p13 = scmp.lt.s32.totalorder %s910_s17, %s910_s17 }
  0x1c   :  { %p917_p0 = por %p916_p13, %p915_p12 }
  0x1e   :  { %p918_p1 = pnand %p917_p0, %p911_p11 }
  0x20   :  { %921 = shalt.err (!%p918_p1)
}
  0x21   :  { %52 = dma.hbm_to_vmem [thread:$0]  %s1184_s7, 256, %s47_s28, [#allocation5], %s927_s23, %s927_s23, %s928_s24  }
  0x22   :  { %922 = dma.done.wait [#allocation3], 2048  }
  0x23   :  { %923 = vsyncadd [#allocation3], 4294965248 }
  0x24   :  { %924 = dma.done.wait [#allocation5], 256  }
  0x25   :  { %925 = vsyncadd [#allocation5], 4294967040  ;;  %v930_v0 = vmov 0   ;;  %v931_v1 = vmov 1   ;;  %v932_v2 = vmov 0.0|0.0   ;;  %v63_v3 = vld [vmem:[%s1178_s1] sm:$0xff]  ;;  %v64_v30 = vlaneseq }
  0x26   :  { %875 = vset.pattern.permute.xlu0 %v930_v0  ;;  %876 = vset.pattern.permute.xlu1 %v931_v1  ;;  %v72_v4 = vld [vmem:[%s1177_s0] sm:$0xff]  ;;  %v95_v6 = vld [vmem:[%s1180_s3 + $0x8] sm:$0xff]  ;;  %vm933_vm0 = vmmov 0   ;;  %v934_v8 = vmov 0.0   ;;  %v174_v11 = vld [vmem:[%s1181_s4 + $0x10] sm:$0xff]  ;;  %vm96_vm1 = vcmask 130048  }
  0x27   :  { %782 = vmatprep.subr.bf16.mxu0 %v932_v2  ;;  %788 = vmatprep.subr.bf16.mxu1 %v932_v2  ;;  %v94_v5 = vld [vmem:[%s1180_s3] sm:$0xff]  ;;  %v173_v10 = vld [vmem:[%s1181_s4 + $0x8] sm:$0xff]  ;;  %v175_v13 = vld [vmem:[%s1181_s4 + $0x18] sm:$0xff]  ;;  %v65_v31 = vand.u32 127, %v64_v30  ;;  %v80_v0 = vshrl.u32 %v64_v30, 7  ;;  %vm583_vm3 = vcmask 15360  }
  0x28   :  { %67 = vperm.xlu0 %875, %v63_v3   ;;  %85 = vperm.xlu1 %876, %v72_v4   ;;  %v783_v7 = vpack.c.bf16 %v95_v6, %v94_v5  ;;  %v172_v9 = vld [vmem:[%s1181_s4] sm:$0xff]  ;;  %v792_v14 = vpack.c.bf16 %v175_v13, %v174_v11  ;;  %v177_v16 = vld [vmem:[%s1181_s4 + $0x28] sm:$0xff]  ;;  %v178_v18 = vld [vmem:[%s1181_s4 + $0x30] sm:$0xff] }
  0x29   :  { %660 = vmatprep.mubr.msk.f32.mxu0 %vm933_vm0, %v934_v8  ;;  %702 = vmatprep.mubr.msk.f32.mxu1 %vm933_vm0, %v934_v8  ;;  %v789_v12 = vpack.c.bf16 %v173_v10, %v172_v9  ;;  %v176_v15 = vld [vmem:[%s1181_s4 + $0x20] sm:$0xff]  ;;  %v179_v19 = vld [vmem:[%s1181_s4 + $0x38] sm:$0xff]  ;;  %v181_v22 = vld [vmem:[%s1181_s4 + $0x48] sm:$0xff]  ;;  %v81_v3 = vsub.s32 0, %v80_v0 }
  0x2a   :  { %784 = vmatpush3.bf16.msra.mxu0 %v783_v7  ;;  %v795_v17 = vpack.c.bf16 %v177_v16, %v176_v15  ;;  %v798_v20 = vpack.c.bf16 %v179_v19, %v178_v18  ;;  %v180_v21 = vld [vmem:[%s1181_s4 + $0x40] sm:$0xff]  ;;  %v182_v24 = vld [vmem:[%s1181_s4 + $0x50] sm:$0xff]  ;;  %v183_v25 = vld [vmem:[%s1181_s4 + $0x58] sm:$0xff] }
  0x2b   :  { %785 = vmatprep.subr.bf16.mxu0 %v932_v2  ;;  %790 = vmatpush3.bf16.msra.mxu1 %v789_v12  ;;  %v801_v23 = vpack.c.bf16 %v181_v22, %v180_v21  ;;  %v804_v26 = vpack.c.bf16 %v183_v25, %v182_v24  ;;  %v184_v27 = vld [vmem:[%s1181_s4 + $0x60] sm:$0xff]  ;;  %v185_v28 = vld [vmem:[%s1181_s4 + $0x68] sm:$0xff]  ;;  %v348_v37 = vld [vmem:[#allocation4 + $0x8] sm:$0xff] }
  0x2c   :  { %76 = vperm.xlu0 %875, %v72_v4   ;;  %791 = vmatprep.subr.bf16.mxu1 %v932_v2  ;;  %v807_v29 = vpack.c.bf16 %v185_v28, %v184_v27  ;;  %v188_v32 = vld [vmem:[%s1182_s5] sm:$0xff]  ;;  %v189_v33 = vld [vmem:[%s1182_s5 + $0x8] sm:$0xff]  ;;  %v186_v40 = vld [vmem:[%s1181_s4 + $0x70] sm:$0xff] }
  0x2d   :  { %v786_v35 = vpack.c.bf16 %v189_v33, %v188_v32  ;;  %v347_v36 = vld [vmem:[#allocation4] sm:$0xff]  ;;  %v187_v41 = vld [vmem:[%s1181_s4 + $0x78] sm:$0xff]  ;;  %v332_v44 = vld [vmem:[#allocation2 + $0x8] sm:$0xff] }
  0x2e   :  { %v813_v39 = vpack.c.bf16 %v348_v37, %v347_v36  ;;  %v810_v42 = vpack.c.bf16 %v187_v41, %v186_v40  ;;  %v331_v43 = vld [vmem:[#allocation2] sm:$0xff]  ;;  %v333_v45 = vld [vmem:[#allocation2 + $0x10] sm:$0xff]  ;;  %v334_v47 = vld [vmem:[#allocation2 + $0x18] sm:$0xff] }
  0x2f   :  { %793 = vmatpush3.bf16.msra.mxu1 %v792_v14  ;;  %v816_v46 = vpack.c.bf16 %v332_v44, %v331_v43  ;;  %v819_v48 = vpack.c.bf16 %v334_v47, %v333_v45  ;;  %v335_v49 = vld [vmem:[#allocation2 + $0x20] sm:$0xff]  ;;  %v336_v50 = vld [vmem:[#allocation2 + $0x28] sm:$0xff]  ;;  %v337_v52 = vld [vmem:[#allocation2 + $0x30] sm:$0xff] }
  0x30   :  { %877 = vset.pattern.permute.xlu0 %v931_v1  ;;  %794 = vmatprep.subr.bf16.mxu1 %v932_v2  ;;  %v822_v51 = vpack.c.bf16 %v336_v50, %v335_v49  ;;  %v338_v53 = vld [vmem:[#allocation2 + $0x38] sm:$0xff]  ;;  %v339_v55 = vld [vmem:[#allocation2 + $0x40] sm:$0xff]  ;;  %v340_v56 = vld [vmem:[#allocation2 + $0x48] sm:$0xff]  ;;  %v90_v1 = vsub.s32 1, %v80_v0 }
  0x31   :  { %v825_v54 = vpack.c.bf16 %v338_v53, %v337_v52  ;;  %v828_v57 = vpack.c.bf16 %v340_v56, %v339_v55  ;;  %v341_v58 = vld [vmem:[#allocation2 + $0x50] sm:$0xff]  ;;  %v342_v59 = vld [vmem:[#allocation2 + $0x58] sm:$0xff]  ;;  %v343_v61 = vld [vmem:[#allocation2 + $0x60] sm:$0xff] }
  0x32   :  { %v831_v60 = vpack.c.bf16 %v342_v59, %v341_v58  ;;  %v344_v62 = vld [vmem:[#allocation2 + $0x68] sm:$0xff]  ;;  %v73_v4 = vld [vmem:[%s1179_s2] sm:$0x3]  ;;  %v345_v19 = vld [vmem:[#allocation2 + $0x70] sm:$0xff] }
  0x33   :  { %796 = vmatpush3.bf16.msra.mxu1 %v795_v17  ;;  %v834_v63 = vpack.c.bf16 %v344_v62, %v343_v61  ;;  %v91_v5 = vrot.slane %v73_v4, %v90_v1  ;;  %v82_v6 = vrot.slane %v73_v4, %v81_v3  ;;  %v490_v22 = vld [vmem:[%s1185_s8] sm:$0xff]  ;;  %v492_v24 = vld [vmem:[%s1185_s8 + $0x10] sm:$0xff]  ;;  %v495_v28 = vld [vmem:[%s1185_s8 + $0x28] sm:$0xff] }
  0x34   :  { %797 = vmatprep.subr.bf16.mxu1 %v932_v2  ;;  %v494_v27 = vld [vmem:[%s1185_s8 + $0x20] sm:$0xff]  ;;  %v496_v30 = vld [vmem:[%s1185_s8 + $0x30] sm:$0xff]  ;;  %v501_v37 = vld [vmem:[%s1185_s8 + $0x58] sm:$0xff] }
  0x35   :  { %v498_v33 = vld [vmem:[%s1185_s8 + $0x40] sm:$0xff]  ;;  %v500_v36 = vld [vmem:[%s1185_s8 + $0x50] sm:$0xff]  ;;  %v503_v40 = vld [vmem:[%s1185_s8 + $0x68] sm:$0xff] }
  0x36   :  { %v505_v47 = vld [vmem:[%s1185_s8 + $0x78] sm:$0xff] }
  0x37   :  { %799 = vmatpush3.bf16.msra.mxu1 %v798_v20  ;;  %v346_v20 = vld [vmem:[#allocation2 + $0x78] sm:$0xff] }
  0x38   :  { %800 = vmatprep.subr.bf16.mxu1 %v932_v2  ;;  %v837_v21 = vpack.c.bf16 %v346_v20, %v345_v19 }
  0x3b   :  { %802 = vmatpush3.bf16.msra.mxu1 %v801_v23  ;;  %v491_v23 = vld [vmem:[%s1185_s8 + $0x8] sm:$0xff] }
  0x3c   :  { %803 = vmatprep.subr.bf16.mxu1 %v932_v2  ;;  %v840_v25 = vpack.c.bf16 %v491_v23, %v490_v22 }
  0x3f   :  { %805 = vmatpush3.bf16.msra.mxu1 %v804_v26 }
  0x40   :  { %806 = vmatprep.subr.bf16.mxu1 %v932_v2 }
  0x43   :  { %808 = vmatpush3.bf16.msra.mxu1 %v807_v29  ;;  %v846_v29 = vpack.c.bf16 %v495_v28, %v494_v27 }
  0x44   :  { %809 = vmatprep.subr.bf16.mxu1 %v932_v2 }
  0x47   :  { %811 = vmatpush3.bf16.msra.mxu1 %v810_v42 }
  0x48   :  { %839 = vmatprep.subr.bf16.mxu1 %v932_v2 }
  0xa7   :  { %v68_v34 = vpop.permute.xlu0 %67  ;;  %v86_v7 = vpop.permute.xlu1 %85 }
  0xa8   :  { %vm69_vm2 = vcmp.eq.s32.totalorder %v68_v34, %v65_v31  ;;  %v92_v10 = vmul.f32 %v91_v5, %v86_v7  ;;  %v497_v31 = vld [vmem:[%s1185_s8 + $0x38] sm:$0xff]  ;;  %v499_v34 = vld [vmem:[%s1185_s8 + $0x48] sm:$0xff] }
  0xa9   :  { %v591_v38 = vsel %vm69_vm2, 1.0, %v934_v8  ;;  %v849_v32 = vpack.c.bf16 %v497_v31, %v496_v30 }
  0xaa   :  { %661 = vmatmul.mubr.msk.f32.vlgmr.msra.gmra.mrb[0].mxu0 %vm96_vm1, %v591_v38 }
  0xab   :  { %787 = vmatpush3.bf16.msra.mxu0 %v786_v35  ;;  %667 = vmatprep.mubr.msk.f32.mxu0 %vm933_vm0, %v934_v8  ;;  %v77_v9 = vpop.permute.xlu0 %76  ;;  %v852_v35 = vpack.c.bf16 %v499_v34, %v498_v33 }
  0xac   :  { %812 = vmatprep.subr.bf16.mxu0 %v932_v2  ;;  %v83_v11 = vmul.f32 %v82_v6, %v77_v9 }
  0xae   :  { %668 = vmatmul.mubr.msk.f32.vlgmr.msra.gmra.mrb[2].mxu0 %vm96_vm1, %v591_v38  ;;  %v93_v12 = vadd.f32 %v92_v10, %v83_v11 }
  0xaf   :  { %814 = vmatpush3.bf16.msra.mxu0 %v813_v39  ;;  %709 = vmatprep.mubr.msk.f32.mxu0 %vm933_vm0, %v934_v8  ;;  %v502_v39 = vld [vmem:[%s1185_s8 + $0x60] sm:$0xff] }
  0xb0   :  { %815 = vmatprep.subr.bf16.mxu0 %v932_v2  ;;  %v858_v41 = vpack.c.bf16 %v503_v40, %v502_v39 }
  0xb2   :  { %710 = vmatmul.mubr.msk.f32.vlgmr.msra.gmra.mrb[4].mxu0 %vm96_vm1, %v591_v38  ;;  %v855_v38 = vpack.c.bf16 %v501_v37, %v500_v36 }
  0xb3   :  { %744 = vmatprep.mubr.msk.f32.mxu0 %vm933_vm0, %v934_v8  ;;  %817 = vmatpush3.bf16.msra.mxu0 %v816_v46  ;;  %v504_v46 = vld [vmem:[%s1185_s8 + $0x70] sm:$0xff] }
  0xb4   :  { %818 = vmatprep.subr.bf16.mxu0 %v932_v2 }
  0xb7   :  { %820 = vmatpush3.bf16.msra.mxu0 %v819_v48  ;;  %v861_v48 = vpack.c.bf16 %v505_v47, %v504_v46 }
  0xb8   :  { %821 = vmatprep.subr.bf16.mxu0 %v932_v2 }
  0xbb   :  { %823 = vmatpush3.bf16.msra.mxu0 %v822_v51 }
  0xbc   :  { %824 = vmatprep.subr.bf16.mxu0 %v932_v2 }
  0xbf   :  { %826 = vmatpush3.bf16.msra.mxu0 %v825_v54 }
  0xc0   :  { %827 = vmatprep.subr.bf16.mxu0 %v932_v2 }
  0xc3   :  { %829 = vmatpush3.bf16.msra.mxu0 %v828_v57 }
  0xc4   :  { %830 = vmatprep.subr.bf16.mxu0 %v932_v2 }
  0xc7   :  { %832 = vmatpush3.bf16.msra.mxu0 %v831_v60 }
  0xc8   :  { %833 = vmatprep.subr.bf16.mxu0 %v932_v2 }
  0xcb   :  { %835 = vmatpush3.bf16.msra.mxu0 %v834_v63 }
  0xcc   :  { %836 = vmatprep.subr.bf16.mxu0 %v932_v2 }
  0xcf   :  { %838 = vmatpush3.bf16.msra.mxu0 %v837_v21 }
 0x17d   :  { %v166_v13 = vpop.f32.mrb[0].mxu0 }
 0x17e   :  { %v170_v14 = vadd.f32 %v166_v13, %v93_v12  ;;  %v662_v15 = vpop.f32.mrb[1].mxu0 }
 0x180   :  { %v171_v16 = vmax.f32 %v170_v14, 0.0 }
 0x181   :  { %v256_v17 = vpop.f32.mrb[2].mxu0 }
 0x182   :  { %v669_v18 = vpop.f32.mrb[3].mxu0  ;;  %703 = vmatmul.mubr.f32.vlgmr.msra.gmra.mrb[0].mxu1 %v171_v16 }
 0x183   :  { %779 = vmatprep.mubr.msk.f32.mxu1 %vm933_vm0, %v934_v8  ;;  %v493_v8 = vld [vmem:[%s1185_s8 + $0x18] sm:$0xff]  ;;  %841 = vmatpush3.bf16.msra.mxu1 %v840_v25 }
 0x184   :  { %v843_v26 = vpack.c.bf16 %v493_v8, %v492_v24  ;;  %842 = vmatprep.subr.bf16.mxu1 %v932_v2 }
 0x187   :  { %844 = vmatpush3.bf16.msra.mxu1 %v843_v26 }
 0x188   :  { %845 = vmatprep.subr.bf16.mxu1 %v932_v2 }
 0x18b   :  { %847 = vmatpush3.bf16.msra.mxu1 %v846_v29 }
 0x18c   :  { %848 = vmatprep.subr.bf16.mxu1 %v932_v2 }
 0x18f   :  { %850 = vmatpush3.bf16.msra.mxu1 %v849_v32 }
 0x190   :  { %851 = vmatprep.subr.bf16.mxu1 %v932_v2 }
 0x193   :  { %853 = vmatpush3.bf16.msra.mxu1 %v852_v35 }
 0x194   :  { %854 = vmatprep.subr.bf16.mxu1 %v932_v2 }
 0x197   :  { %856 = vmatpush3.bf16.msra.mxu1 %v855_v38 }
 0x198   :  { %857 = vmatprep.subr.bf16.mxu1 %v932_v2 }
 0x19b   :  { %859 = vmatpush3.bf16.msra.mxu1 %v858_v41 }
 0x19c   :  { %860 = vmatprep.subr.bf16.mxu1 %v932_v2  ;;  %v595_v2 = vld [vmem:[%s1186_s9] ss:$0 sm:$0xff] }
 0x19f   :  { %862 = vmatpush3.bf16.msra.mxu1 %v861_v48 }
 0x255   :  { %v326_v42 = vpop.f32.mrb[0].mxu1 }
 0x256   :  { %v327_v43 = vadd.f32 %v326_v42, %v256_v17  ;;  %v704_v44 = vpop.f32.mrb[1].mxu1 }
 0x258   :  { %v330_v45 = vmax.f32 %v327_v43, 0.0 }
 0x25a   :  { %745 = vmatmul.mubr.f32.vlgmr.msra.gmra.mrb[4].mxu0 %v330_v45 }
 0x32d   :  { %v485_v49 = vpop.f32.mrb[4].mxu0 }
 0x32e   :  { %v489_v50 = vmax.f32 %v485_v49, 0.0  ;;  %v746_v51 = vpop.f32.mrb[5].mxu0 }
 0x330   :  { %780 = vmatmul.mubr.f32.vlgmr.msra.gmra.mrb[2].mxu1 %v489_v50 }
 0x403   :  { %v579_v52 = vpop.f32.mrb[2].mxu1 }
 0x404   :  { %v580_v53 = vadd.f32 %v595_v2, %v579_v52  ;;  %v781_v54 = vpop.f32.mrb[3].mxu1 }
 0x406   :  { %584 = vst.msk [vmem:[%s1187_s10] sm:$0xff] %vm583_vm3, %v580_v53 }
 0x407   :  { %589 = vsyncpa [#allocation3], 1 }
 0x408   :  { %590 = vsyncpa [#allocation5], 1 }

</bundles_post_ra>
